<compile_context>
chip_gen: v7x
topology: tpu7x:2x2x1
jax: 0.10.0
libtpu: 0.0.40
codegen_flags: <defaults>
</compile_context>

<pallas_src>
import jax
import jax.numpy as jnp
import numpy as np
from jax import lax
from jax.experimental import pallas as pl
from jax.experimental.pallas import tpu as pltpu

# ------------------------- model hyper-parameters ---------------------------
B = 2            # batch
S = 8            # sequence length
H = 32           # hidden size (critic_head.in_features == lm_head.in_features)
V = 128          # vocab size
N_HEADS = 2
HEAD_DIM = H // N_HEADS
MLP_DIM = 4 * H
NUM_ACTIONS = 4


# ----------------------------- Pallas kernel --------------------------------
def _fused_heads_kernel(tgt_ref, ht_ref, w_ref, bc_ref, logp_ref, val_ref):
    """Fused actor/critic heads, single invocation.

    tgt_ref : (1, BS)   int32  VMEM   shifted target token ids (lane-dense)
    ht_ref  : (H, BS)   bf16   VMEM   last hidden state, transposed
    w_ref   : (V+1, H)  bf16   VMEM   [lm_head.weight ; critic_head.weight]
    bc_ref  : (1,)      f32    SMEM   critic bias
    logp_ref: (1, BS)   f32    VMEM   log p(target token)
    val_ref : (1, BS)   f32    VMEM   critic value
    """
    v = w_ref.shape[0] - 1                      # vocab rows; last row = critic

    # One MXU pass produces both logits and the critic value (tokens on lanes).
    scores = jnp.dot(w_ref[...], ht_ref[...],
                     preferred_element_type=jnp.float32)        # (V+1, BS) f32
    logits = scores[:v, :]                                      # (V, BS)
    val_row = scores[v:, :]                                     # (1, BS)

    # Numerically-stable log-prob of the target token, without materializing
    # the full log-softmax tile: logp = (logit_tgt - m) - log(sum exp(. - m)).
    m = jnp.max(logits, axis=0, keepdims=True)                  # (1, BS)
    shifted = logits - m                                        # (V, BS)
    sumexp = jnp.sum(jnp.exp(shifted), axis=0, keepdims=True)   # (1, BS)

    row_ids = lax.broadcasted_iota(jnp.int32, logits.shape, 0)  # (V, BS)
    is_tgt = row_ids == tgt_ref[...]                            # bcast (1,BS)
    tgt_logit = jnp.sum(jnp.where(is_tgt, shifted, 0.0),
                        axis=0, keepdims=True)                  # (1, BS)

    logp_ref[...] = tgt_logit - jnp.log(sumexp)
    val_ref[...] = val_row + bc_ref[0]


def actor_critic_heads(last_hidden, shifted_targets, w_lm, w_c, b_c):
    """Runs the fused heads kernel in ONE step (batch folded into lanes)."""
    b, s, h = last_hidden.shape
    bs = b * s

    # Layout plumbing (outside the kernel): tokens onto the lane axis.
    ht = last_hidden.reshape(bs, h).T                    # (H, BS), bf16
    tgt = shifted_targets.reshape(1, bs).astype(jnp.int32)

    # Fuse critic head as one extra weight row -> single MXU pass.
    # (In production this concat would be precomputed once.)
    w_ext = jnp.concatenate([w_lm, w_c], axis=0)         # (V+1, H), bf16

    logp, val = pl.pallas_call(
        _fused_heads_kernel,
        out_shape=(jax.ShapeDtypeStruct((1, bs), jnp.float32),
                   jax.ShapeDtypeStruct((1, bs), jnp.float32)),
        in_specs=[
            pl.BlockSpec(memory_space=pltpu.MemorySpace.VMEM),   # targets
            pl.BlockSpec(memory_space=pltpu.MemorySpace.VMEM),   # hidden^T
            pl.BlockSpec(memory_space=pltpu.MemorySpace.VMEM),   # [W_lm; w_c]
            pl.BlockSpec(memory_space=pltpu.MemorySpace.SMEM),   # critic bias
        ],
        out_specs=(pl.BlockSpec(memory_space=pltpu.MemorySpace.VMEM),
                   pl.BlockSpec(memory_space=pltpu.MemorySpace.VMEM)),
    )(tgt, ht, w_ext, b_c)

    return logp.reshape(b, s), val.reshape(b, s)


# ------------------------- synthetic backbone (glue) ------------------------
# TODO(synk): AutoModelForCausalLM.from_pretrained / generate / process_sequences
# have no Pallas equivalent; a deterministic 1-layer causal transformer stands
# in for the backbone and is computed in plain JAX (bf16 output, like the
# torch_dtype=bfloat16 HF model).
def _layer_norm(x, g, b, eps=1e-5):
    mu = jnp.mean(x, axis=-1, keepdims=True)
    var = jnp.mean((x - mu) ** 2, axis=-1, keepdims=True)
    return (x - mu) * lax.rsqrt(var + eps) * g + b


def backbone(params, sequences, attention_mask, position_ids):
    x = params["tok_emb"][sequences] + params["pos_emb"][position_ids]   # (B,S,H)
    bsz, s, h = x.shape

    hnorm = _layer_norm(x, params["ln1_g"], params["ln1_b"])
    q = hnorm @ params["wq"]
    k = hnorm @ params["wk"]
    v = hnorm @ params["wv"]
    q = q.reshape(bsz, s, N_HEADS, HEAD_DIM).transpose(0, 2, 1, 3)
    k = k.reshape(bsz, s, N_HEADS, HEAD_DIM).transpose(0, 2, 1, 3)
    v = v.reshape(bsz, s, N_HEADS, HEAD_DIM).transpose(0, 2, 1, 3)
    scores = jnp.einsum("bhqd,bhkd->bhqk", q, k) / jnp.sqrt(jnp.float32(HEAD_DIM))
    causal = jnp.tril(jnp.ones((s, s), dtype=bool))
    key_ok = attention_mask[:, None, None, :] > 0
    scores = jnp.where(causal[None, None] & key_ok, scores, -1e9)
    probs = jax.nn.softmax(scores, axis=-1)
    att = jnp.einsum("bhqk,bhkd->bhqd", probs, v)
    att = att.transpose(0, 2, 1, 3).reshape(bsz, s, h)
    x = x + att @ params["wo"]

    h2 = _layer_norm(x, params["ln2_g"], params["ln2_b"])
    mlp = jax.nn.gelu(h2 @ params["w1"] + params["b1"]) @ params["w2"] + params["b2"]
    x = x + mlp
    out = _layer_norm(x, params["lnf_g"], params["lnf_b"])
    return out.astype(jnp.bfloat16)                      # bf16 hidden states


# ------------------------------ forward pass --------------------------------
def actor_critic_forward(params, sequences, attention_mask, num_actions):
    """Mirrors ActorCritic.forward (packing_samples=False):
       returns (log_probs[:, -num_actions:], value[:, -num_actions:])."""
    am = attention_mask.astype(jnp.int32)
    position_ids = jnp.cumsum(am, axis=-1) - 1
    position_ids = jnp.where(am == 0, 1, position_ids)          # masked_fill_(mask==0, 1)

    last_hidden = backbone(params, sequences, am, position_ids)  # (B,S,H) bf16

    bsz, s = sequences.shape
    # labels for log_probs_from_logits(logits[:, :-1, :], sequences[:, 1:])
    shifted = jnp.concatenate(
        [sequences[:, 1:], jnp.zeros((bsz, 1), sequences.dtype)], axis=1)

    logp_all, val_all = actor_critic_heads(
        last_hidden, shifted, params["w_lm"], params["w_c"], params["b_c"])

    log_probs = logp_all[:, : s - 1]          # logits[:, :-1] vs sequences[:, 1:]
    value = val_all[:, : s - 1]               # critic(hidden).squeeze(-1)[:, :-1]
    return log_probs[:, -num_actions:], value[:, -num_actions:], last_hidden


# ----------------------------- parameter init -------------------------------
def init_params(key):
    ks = jax.random.split(key, 16)

    def nrm(k, shape, scale=0.02):
        return scale * jax.random.normal(k, shape, dtype=jnp.float32)

    return {
        "tok_emb": nrm(ks[0], (V, H)),
        "pos_emb": nrm(ks[1], (S, H)),
        "wq": nrm(ks[2], (H, H)), "wk": nrm(ks[3], (H, H)),
        "wv": nrm(ks[4], (H, H)), "wo": nrm(ks[5], (H, H)),
        "ln1_g": jnp.ones((H,), jnp.float32), "ln1_b": jnp.zeros((H,), jnp.float32),
        "ln2_g": jnp.ones((H,), jnp.float32), "ln2_b": jnp.zeros((H,), jnp.float32),
        "lnf_g": jnp.ones((H,), jnp.float32), "lnf_b": jnp.zeros((H,), jnp.float32),
        "w1": nrm(ks[6], (H, MLP_DIM)), "b1": jnp.zeros((MLP_DIM,), jnp.float32),
        "w2": nrm(ks[7], (MLP_DIM, H)), "b2": jnp.zeros((H,), jnp.float32),
        # PyTorch layouts: lm_head.weight (V, H) bf16; critic_head.weight (1, H).
        "w_lm": nrm(ks[8], (V, H)).astype(jnp.bfloat16),
        "w_c": nrm(ks[9], (1, H)).astype(jnp.bfloat16),
        "b_c": jnp.zeros((1,), jnp.float32),              # nn.init.zeros_(bias)
    }


# ---------------------------------- main -------------------------------------
if __name__ == "__main__":
    key = jax.random.PRNGKey(0)
    params = init_params(key)

    kseq, _ = jax.random.split(jax.random.PRNGKey(0))
    sequences = jax.random.randint(kseq, (B, S), 0, V, dtype=jnp.int32)
    # left-padded first example, fully dense second example
    attention_mask = jnp.array(
        [[0, 1, 1, 1, 1, 1, 1, 1],
         [1, 1, 1, 1, 1, 1, 1, 1]], dtype=jnp.int32)

    log_probs, value, last_hidden = actor_critic_forward(
        params, sequences, attention_mask, NUM_ACTIONS)
    jax.block_until_ready((log_probs, value))

    # ---- pure-JAX reference check of the Pallas-fused heads ----
    h2d = last_hidden.reshape(B * S, H).astype(jnp.float32)
    w_lm_f = params["w_lm"].astype(jnp.float32)
    w_c_f = params["w_c"].astype(jnp.float32)
    logits_ref = (h2d @ w_lm_f.T).reshape(B, S, V)
    logsm_ref = jax.nn.log_softmax(logits_ref[:, :-1, :], axis=-1)
    lp_ref = jnp.take_along_axis(
        logsm_ref, sequences[:, 1:, None], axis=-1)[..., 0]             # (B,S-1)
    val_ref = (h2d @ w_c_f.T).reshape(B, S) + params["b_c"][0]
    val_ref = val_ref[:, :-1]

    assert log_probs.shape == (B, NUM_ACTIONS)
    assert value.shape == (B, NUM_ACTIONS)
    np.testing.assert_allclose(np.asarray(log_probs),
                               np.asarray(lp_ref[:, -NUM_ACTIONS:]),
                               rtol=2e-4, atol=2e-4)
    np.testing.assert_allclose(np.asarray(value),
                               np.asarray(val_ref[:, -NUM_ACTIONS:]),
                               rtol=2e-4, atol=2e-4)
    print("KERNEL_OK")
</pallas_src>

<mosaic_0001>
module attributes {stable_mosaic.version = 11 : i64} {
  func.func @_fused_heads_kernel(%arg0: memref<1x16xi32, #tpu.memory_space<vmem>>, %arg1: memref<32x16xbf16, #tpu.memory_space<vmem>>, %arg2: memref<129x32xbf16, #tpu.memory_space<vmem>>, %arg3: memref<1xf32, #tpu.memory_space<smem>>, %arg4: memref<1x16xf32, #tpu.memory_space<vmem>>, %arg5: memref<1x16xf32, #tpu.memory_space<vmem>>) attributes {dimension_semantics = [], scalar_prefetch = 0 : i64, scratch_operands = 0 : i64, tpu.core_type = #tpu.core_type<tc>} {
    %c0 = arith.constant 0 : index
    %c0_0 = arith.constant 0 : index
    %0 = vector.load %arg2[%c0, %c0_0] : memref<129x32xbf16, #tpu.memory_space<vmem>>, vector<129x32xbf16>
    %c0_1 = arith.constant 0 : index
    %c0_2 = arith.constant 0 : index
    %1 = vector.load %arg1[%c0_1, %c0_2] : memref<32x16xbf16, #tpu.memory_space<vmem>>, vector<32x16xbf16>
    %cst = arith.constant dense<0.000000e+00> : vector<129x16xf32>
    %2 = tpu.matmul %0, %1, %cst {dimension_numbers = #tpu.dot_dimension_numbers<[1], [0], [0], [1], [0, 0, 1, 1], [], []>} : vector<129x32xbf16>, vector<32x16xbf16>, vector<129x16xf32> -> vector<129x16xf32>
    %3 = vector.extract_strided_slice %2 {offsets = [0, 0], sizes = [128, 16], strides = [1, 1]} : vector<129x16xf32> to vector<128x16xf32>
    %4 = vector.extract_strided_slice %2 {offsets = [128, 0], sizes = [1, 16], strides = [1, 1]} : vector<129x16xf32> to vector<1x16xf32>
    %cst_3 = arith.constant dense<0xFF800000> : vector<16xf32>
    %5 = vector.multi_reduction <maximumf>, %3, %cst_3 [0] : vector<128x16xf32> to vector<16xf32>
    %6 = vector.shape_cast %5 : vector<16xf32> to vector<1x16xf32>
    %7 = vector.broadcast %6 : vector<1x16xf32> to vector<128x16xf32>
    %8 = arith.subf %3, %7 : vector<128x16xf32>
    %9 = math.exp %8 : vector<128x16xf32>
    %cst_4 = arith.constant dense<0.000000e+00> : vector<16xf32>
    %10 = vector.multi_reduction <add>, %9, %cst_4 [0] : vector<128x16xf32> to vector<16xf32>
    %11 = vector.shape_cast %10 : vector<16xf32> to vector<1x16xf32>
    %12 = tpu.iota {dimensions = array<i32: 0>} : vector<128x16xi32>
    %c0_5 = arith.constant 0 : index
    %c0_6 = arith.constant 0 : index
    %13 = vector.load %arg0[%c0_5, %c0_6] : memref<1x16xi32, #tpu.memory_space<vmem>>, vector<1x16xi32>
    %14 = vector.broadcast %13 : vector<1x16xi32> to vector<128x16xi32>
    %15 = arith.cmpi eq, %12, %14 : vector<128x16xi32>
    %cst_7 = arith.constant 0.000000e+00 : f32
    %16 = vector.broadcast %cst_7 : f32 to vector<128x16xf32>
    %17 = arith.select %15, %8, %16 : vector<128x16xi1>, vector<128x16xf32>
    %cst_8 = arith.constant dense<0.000000e+00> : vector<16xf32>
    %18 = vector.multi_reduction <add>, %17, %cst_8 [0] : vector<128x16xf32> to vector<16xf32>
    %19 = vector.shape_cast %18 : vector<16xf32> to vector<1x16xf32>
    %20 = math.log %11 : vector<1x16xf32>
    %21 = arith.subf %19, %20 : vector<1x16xf32>
    %c0_9 = arith.constant 0 : index
    %c0_10 = arith.constant 0 : index
    %22 = vector.load %arg4[%c0_9, %c0_10] : memref<1x16xf32, #tpu.memory_space<vmem>>, vector<1x16xf32>
    tpu.vector_store %arg4[%c0_9, %c0_10], %21 {strides = array<i32>} : memref<1x16xf32, #tpu.memory_space<vmem>>, vector<1x16xf32>,
    %c0_11 = arith.constant 0 : index
    %23 = memref.load %arg3[%c0_11] : memref<1xf32, #tpu.memory_space<smem>>
    %24 = vector.broadcast %23 : f32 to vector<1x16xf32>
    %25 = arith.addf %4, %24 : vector<1x16xf32>
    %c0_12 = arith.constant 0 : index
    %c0_13 = arith.constant 0 : index
    %26 = vector.load %arg5[%c0_12, %c0_13] : memref<1x16xf32, #tpu.memory_space<vmem>>, vector<1x16xf32>
    tpu.vector_store %arg5[%c0_12, %c0_13], %25 {strides = array<i32>} : memref<1x16xf32, #tpu.memory_space<vmem>>, vector<1x16xf32>,
    return
  }
}

</mosaic_0001>

<bundles_post_ra>
// kernel: tpu_custom_call.1
= control target key start
LH: loop header
LB: loop body
LE: loop exit
PB: predicated region body
PF: predicated region fallthrough
CT: control target
= control target key end

     0   :  { %12 = vsyncpa [#allocation4], 0  ;;  %v655_v1 = vmov 0.0   ;;  %vm656_vm0 = vmmov 0   ;;  %vm99_vm1 = vcmask 261120   ;;  %s1004_s0 = inlined_call_operand.vmem [shape: s32[1,16], index: 0, kind: input, shape index: {}]   ;;  %s1005_s1 = inlined_call_operand.vmem [shape: bf16[32,16], index: 1, kind: input, shape index: {}]   ;;  %s1006_s2 = inlined_call_operand.vmem [shape: bf16[129,32], index: 2, kind: input, shape index: {}]   ;;  %s1007_s3 = inlined_call_operand.<no memory space> [shape: f32[1], index: 3, kind: input, shape index: {}]   ;;  %s1008_s4 = inlined_call_operand.hbm [shape: f32[1,16], index: 4, kind: output, shape index: {0}]   ;;  %s1009_s5 = inlined_call_operand.hbm [shape: f32[1,16], index: 5, kind: output, shape index: {1}]  }
   0x1   :  { %v562_v0 = vld [vmem:[%s1005_s1] sm:$0xff]   ;;  %514 = vmatprep.subr.bf16.mxu0 %v655_v1  ;;  %554 = vmatprep.subr.bf16.mxu1 %v655_v1  ;;  %v563_v2 = vld [vmem:[%s1005_s1 + $0x8] sm:$0xff]  }
   0x2   :  { %515 = vmatpush3.bf16.msra.mxu0 %v562_v0  ;;  %518 = vmatprep.mubr.msk.bf16.mxu0 %vm656_vm0, %v655_v1  ;;  %v564_v3 = vld [vmem:[%s1006_s2] sm:$0xff]   ;;  %v566_v4 = vld [vmem:[%s1006_s2 + $0x28] sm:$0xff]  }
   0x3   :  { %516 = vmatprep.subr.bf16.mxu0 %v655_v1  ;;  %556 = vmatpush3.bf16.msra.mxu1 %v562_v0 }
   0x4   :  { %555 = vmatprep.subr.bf16.mxu1 %v655_v1  ;;  %538 = vmatprep.mubr.msk.bf16.mxu1 %vm656_vm0, %v655_v1 }
   0x6   :  { %517 = vmatpush3.bf16.msra.mxu0 %v563_v2 }
   0x7   :  { %557 = vmatpush3.bf16.msra.mxu1 %v563_v2 }
   0x9   :  { %519 = vmatmul.mubr.msk.bf16.vlgmr.msra.gmra.mrb[0].mxu0 %vm99_vm1, %v564_v3 }
   0xa   :  { %522 = vmatprep.mubr.msk.bf16.mxu0 %vm656_vm0, %v655_v1  ;;  %539 = vmatmul.mubr.msk.bf16.vlgmr.msra.gmra.mrb[0].mxu1 %vm99_vm1, %v566_v4 }
   0xb   :  { %542 = vmatprep.mubr.msk.bf16.mxu1 %vm656_vm0, %v655_v1 }
   0xc   :  { %13 = vsyncpa [#allocation6], 0  ;;  %v565_v5 = vld [vmem:[%s1006_s2 + $0x8] sm:$0xff]   ;;  %v568_v6 = vld [vmem:[%s1006_s2 + $0x30] sm:$0xff]   ;;  %vm231_vm2 = vcmask 130048   ;;  %v451_v42 = vstv %s1007_s3  ;;  %s657_s15 = smov [#allocation5]  }
   0xd   :  { %v567_v7 = vld [vmem:[%s1006_s2 + $0x10] sm:$0xff]   ;;  %v570_v8 = vld [vmem:[%s1006_s2 + $0x38] sm:$0xff]   ;;  %v572_v10 = vld [vmem:[%s1006_s2 + $0x40] ss:$0 sps:$4 sm:$0x11]   ;;  %s470_s16 = sshll.u32 %s657_s15, 4  ;;  %s471_s16 = int_to_ptr.vmem [resolvable:$true] %s470_s16 }
   0xe   :  { %v569_v9 = vld [vmem:[%s1006_s2 + $0x18] sm:$0xff]   ;;  %v571_v11 = vld [vmem:[%s1006_s2 + $0x20] sm:$0xff]   ;;  %vm448_vm3 = vcmask 122880   ;;  %s607_s3 = scalar_lea.vmem %s471_s16, 16  ;;  %s611_s17 = scalar_lea.vmem %s471_s16, 32 }
   0xf   :  { %p608_p0 = scmp.ne.s32.totalorder %s471_s16, %s607_s3  ;;  %p612_p1 = scmp.lt.s32.totalorder %s471_s16, %s471_s16 }
  0x10   :  { %p613_p2 = scmp.lt.s32.totalorder %s611_s17, %s607_s3 }
  0x11   :  { %523 = vmatmul.mubr.msk.bf16.gmra.mrb[4].mxu0 %vm99_vm1, %v565_v5 }
  0x12   :  { %526 = vmatprep.mubr.msk.bf16.mxu0 %vm656_vm0, %v655_v1  ;;  %543 = vmatmul.mubr.msk.bf16.gmra.mrb[4].mxu1 %vm99_vm1, %v568_v6  ;;  %p614_p3 = por %p613_p2, %p612_p1 }
  0x13   :  { %546 = vmatprep.mubr.msk.bf16.mxu1 %vm656_vm0, %v655_v1 }
  0x14   :  { %p615_p4 = pnand %p614_p3, %p608_p0 }
  0x19   :  { %527 = vmatmul.mubr.msk.bf16.gmra.mrb[8].mxu0 %vm99_vm1, %v567_v7 }
  0x1a   :  { %530 = vmatprep.mubr.msk.bf16.mxu0 %vm656_vm0, %v655_v1  ;;  %547 = vmatmul.mubr.msk.bf16.gmra.mrb[8].mxu1 %vm99_vm1, %v570_v8 }
  0x1b   :  { %550 = vmatprep.mubr.msk.bf16.mxu1 %vm656_vm0, %v655_v1 }
  0x21   :  { %531 = vmatmul.mubr.msk.bf16.gmra.mrb[12].mxu0 %vm99_vm1, %v569_v9 }
  0x22   :  { %534 = vmatprep.mubr.msk.bf16.mxu0 %vm656_vm0, %v655_v1  ;;  %551 = vmatmul.mubr.msk.bf16.gmra.mrb[12].mxu1 %vm99_vm1, %v572_v10 }
  0x29   :  { %535 = vmatmul.mubr.msk.bf16.gmra.mrb[16].mxu0 %vm99_vm1, %v571_v11 }
  0xdc   :  { %v740_v12 = vpop.f32.mrb[0].mxu0 }
  0xdd   :  { %v520_v13 = vpop.f32.mrb[1].mxu0  ;;  %v742_v14 = vpop.f32.mrb[0].mxu1  ;;  %v232_v29 = vsel %vm231_vm2, %v740_v12, -inf }
  0xde   :  { %v744_v15 = vpop.f32.mrb[2].mxu0  ;;  %v540_v16 = vpop.f32.mrb[1].mxu1  ;;  %v248_v53 = vsel %vm231_vm2, %v742_v14, -inf }
  0xdf   :  { %v521_v17 = vpop.f32.mrb[3].mxu0  ;;  %v746_v18 = vpop.f32.mrb[2].mxu1  ;;  %v233_v36 = vsel %vm231_vm2, %v744_v15, -inf }
  0xe0   :  { %v541_v19 = vpop.f32.mrb[3].mxu1  ;;  %v250_v61 = vsel %vm231_vm2, %v746_v18, -inf }
  0xe4   :  { %v748_v20 = vpop.f32.mrb[4].mxu0 }
  0xe5   :  { %v524_v21 = vpop.f32.mrb[5].mxu0  ;;  %v750_v22 = vpop.f32.mrb[4].mxu1  ;;  %v234_v44 = vsel %vm231_vm2, %v748_v20, -inf }
  0xe6   :  { %v752_v23 = vpop.f32.mrb[6].mxu0  ;;  %v544_v24 = vpop.f32.mrb[5].mxu1 }
  0xe7   :  { %v525_v25 = vpop.f32.mrb[7].mxu0  ;;  %v754_v26 = vpop.f32.mrb[6].mxu1  ;;  %v235_v52 = vsel %vm231_vm2, %v752_v23, -inf }
  0xe8   :  { %v545_v27 = vpop.f32.mrb[7].mxu1 }
  0xec   :  { %v756_v28 = vpop.f32.mrb[8].mxu0 }
  0xed   :  { %v236_v30 = vsel %vm231_vm2, %v756_v28, -inf  ;;  %v528_v31 = vpop.f32.mrb[9].mxu0  ;;  %v762_v32 = vpop.f32.mrb[8].mxu1 }
  0xee   :  { %v237_v33 = vmax.f32 %v232_v29, %v236_v30  ;;  %v764_v34 = vpop.f32.mrb[10].mxu0  ;;  %v548_v35 = vpop.f32.mrb[9].mxu1  ;;  %v256_v56 = vsel %vm231_vm2, %v762_v32, -inf }
  0xef   :  { %v238_v37 = vsel %vm231_vm2, %v764_v34, -inf  ;;  %v529_v38 = vpop.f32.mrb[11].mxu0  ;;  %v770_v39 = vpop.f32.mrb[10].mxu1 }
  0xf0   :  { %v239_v40 = vmax.f32 %v233_v36, %v238_v37  ;;  %v549_v41 = vpop.f32.mrb[11].mxu1  ;;  %v258_v62 = vsel %vm231_vm2, %v770_v39, -inf }
  0xf4   :  { %v775_v43 = vpop.f32.mrb[12].mxu0 }
  0xf5   :  { %v240_v45 = vsel %vm231_vm2, %v775_v43, -inf  ;;  %v532_v46 = vpop.f32.mrb[13].mxu0  ;;  %v225_v47 = vpop.f32.mrb[12].mxu1 }
  0xf6   :  { %v241_v48 = vmax.f32 %v234_v44, %v240_v45  ;;  %v781_v49 = vpop.f32.mrb[14].mxu0  ;;  %v452_v50 = vadd.f32 %v451_v42, %v225_v47  ;;  %v552_v51 = vpop.f32.mrb[13].mxu1 }
  0xf7   :  { %v242_v54 = vsel %vm231_vm2, %v781_v49, -inf  ;;  %v533_v55 = vpop.f32.mrb[15].mxu0  ;;  %v228_v57 = vpop.f32.mrb[14].mxu1 }
  0xf8   :  { %v243_v58 = vmax.f32 %v235_v52, %v242_v54  ;;  %v249_v59 = vmax.f32 %v241_v48, %v248_v53  ;;  %v553_v60 = vpop.f32.mrb[15].mxu1  ;;  %453 = vst.msk [vmem:[#allocation5] sm:$0x1] %vm448_vm3, %v452_v50 }
  0xf9   :  { %618 = shalt.err (!%p615_p4)
}
  0xfa   :  { %s619_s20 = scalar_lea.hbm %s1009_s5, 16 }
  0xfb   :  { %p620_p5 = scmp.ne.s32.totalorder %s1009_s5, %s619_s20  ;;  %p623_p6 = scmp.lt.u32.totalorder %s619_s20, %s1009_s5 }
  0xfd   :  { %p625_p7 = pnand %p623_p6, %p620_p5 }
  0xff   :  { %628 = shalt.err (!%p625_p7)
}
 0x100   :  { %473 = dma.vmem_to_hbm [thread:$0]  %s471_s16, 16, %s1009_s5, [#allocation6]   ;;  %v257_v63 = vmax.f32 %v249_v59, %v256_v56  ;;  %v251_v0 = vmax.f32 %v243_v58, %v250_v61  ;;  %v193_v2 = vpop.f32.mrb[16].mxu0  ;;  %v252_v8 = vsel %vm231_vm2, %v750_v22, -inf  ;;  %v254_v16 = vsel %vm231_vm2, %v754_v26, -inf }
 0x101   :  { %v244_v3 = vsel %vm231_vm2, %v193_v2, -inf  ;;  %v536_v4 = vpop.f32.mrb[17].mxu0  ;;  %v354_v27 = vlaneseq  ;;  %v866_v48 = vld [vmem:[%s1004_s0] ss:$0 sm:$0xff]  ;;  %s658_s0 = smov [#allocation3]  }
 0x102   :  { %v259_v1 = vmax.f32 %v251_v0, %v258_v62  ;;  %v245_v6 = vmax.f32 %v237_v33, %v244_v3  ;;  %v196_v7 = vpop.f32.mrb[18].mxu0  ;;  %s460_s27 = sshll.u32 %s658_s0, 4  ;;  %s461_s27 = int_to_ptr.vmem [resolvable:$true] %s460_s27 }
 0x103   :  { %v246_v9 = vsel %vm231_vm2, %v196_v7, -inf  ;;  %v537_v10 = vpop.f32.mrb[19].mxu0  ;;  %v814_v31 = vshrl.u32 %v354_v27, 7  ;;  %s629_s28 = scalar_lea.vmem %s461_s27, 16  ;;  %s633_s29 = scalar_lea.vmem %s461_s27, 32 }
 0x104   :  { %v261_v5 = vmax.f32 %v257_v63, %v259_v1  ;;  %v253_v11 = vmax.f32 %v245_v6, %v252_v8  ;;  %v247_v13 = vmax.f32 %v239_v40, %v246_v9  ;;  %p630_p8 = scmp.ne.s32.totalorder %s461_s27, %s629_s28  ;;  %p634_p9 = scmp.lt.s32.totalorder %s461_s27, %s461_s27 }
 0x105   :  { %v356_v36 = vadd.s32 8, %v814_v31  ;;  %vm376_vm4 = vcmp.eq.s32.totalorder %v814_v31, %v866_v48  ;;  %v359_v52 = vadd.s32 32, %v814_v31  ;;  %v361_v53 = vadd.s32 48, %v814_v31  ;;  %p635_p10 = scmp.lt.s32.totalorder %s633_s29, %s629_s28 }
 0x106   :  { %v255_v17 = vmax.f32 %v247_v13, %v254_v16  ;;  %v362_v54 = vadd.s32 56, %v814_v31  ;;  %v885_v57 = vadd.s32 64, %v814_v31  ;;  %v888_v59 = vadd.s32 72, %v814_v31 }
 0x107   :  { %vm377_vm5 = vcmp.eq.s32.totalorder %v356_v36, %v866_v48  ;;  %v891_v60 = vadd.s32 80, %v814_v31  ;;  %v894_v61 = vadd.s32 88, %v814_v31  ;;  %v900_v1 = vadd.s32 96, %v814_v31  ;;  %p636_p11 = por %p635_p10, %p634_p9 }
 0x108   :  { %v260_v19 = vmax.f32 %v253_v11, %v255_v17  ;;  %vm380_vm8 = vcmp.eq.s32.totalorder %v359_v52, %v866_v48  ;;  %vm382_vm10 = vcmp.eq.s32.totalorder %v361_v53, %v866_v48  ;;  %vm383_vm11 = vcmp.eq.s32.totalorder %v362_v54, %v866_v48 }
 0x109   :  { %vm384_vm12 = vcmp.eq.s32.totalorder %v885_v57, %v866_v48  ;;  %vm385_vm13 = vcmp.eq.s32.totalorder %v888_v59, %v866_v48  ;;  %vm386_vm14 = vcmp.eq.s32.totalorder %v891_v60, %v866_v48  ;;  %v368_v53 = vadd.s32 104, %v814_v31  ;;  %p637_p12 = pnand %p636_p11, %p630_p8 }
 0x10a   :  { %v262_v21 = vmax.f32 %v260_v19, %v261_v5  ;;  %vm387_vm15 = vcmp.eq.s32.totalorder %v894_v61, %v866_v48  ;;  %vm388_vm0 = vcmp.eq.s32.totalorder %v900_v1, %v866_v48 }
 0x10b   :  { %vm389_vm1 = vcmp.eq.s32.totalorder %v368_v53, %v866_v48 }
 0x10c   :  { %v263_v24 = vrot.slane %v262_v21, 4 }
 0x10e   :  { %v264_v25 = vmax.f32 %v262_v21, %v263_v24 }
 0x110   :  { %v265_v29 = vrot.slane %v264_v25, 2 }
 0x112   :  { %v266_v30 = vmax.f32 %v264_v25, %v265_v29 }
 0x114   :  { %v267_v33 = vrot.slane %v266_v30, 1 }
 0x116   :  { %v816_v35 = vmax.f32 %v266_v30, %v267_v33 }
 0x118   :  { %v269_v37 = vsub.f32 %v740_v12, %v816_v35  ;;  %v270_v38 = vsub.f32 %v744_v15, %v816_v35  ;;  %v271_v40 = vsub.f32 %v748_v20, %v816_v35  ;;  %v272_v41 = vsub.f32 %v752_v23, %v816_v35 }
 0x119   :  { %v273_v42 = vsub.f32 %v756_v28, %v816_v35  ;;  %v831_v44 = vsub.f32 %v764_v34, %v816_v35  ;;  %v835_v45 = vsub.f32 %v775_v43, %v816_v35  ;;  %v839_v12 = vsub.f32 %v781_v49, %v816_v35 }
 0x11a   :  { %v842_v15 = vsub.f32 %v193_v2, %v816_v35  ;;  %v845_v20 = vsub.f32 %v196_v7, %v816_v35  ;;  %v849_v23 = vsub.f32 %v742_v14, %v816_v35  ;;  %v853_v28 = vsub.f32 %v746_v18, %v816_v35 }
 0x11b   :  { %v857_v34 = vsub.f32 %v750_v22, %v816_v35  ;;  %v861_v43 = vsub.f32 %v754_v26, %v816_v35  ;;  %v285_v46 = vmul.f32 1.442695, %v269_v37  ;;  %v287_v47 = vmul.f32 1.442695, %v270_v38 }
 0x11c   :  { %v289_v14 = vmul.f32 1.442695, %v271_v40  ;;  %v291_v49 = vmul.f32 1.442695, %v272_v41  ;;  %v870_v18 = vsub.f32 %v762_v32, %v816_v35  ;;  %v357_v22 = vadd.s32 16, %v814_v31 }
 0x11d   :  { %573 = vpow2.f32 %v285_v46  ;;  %v293_v50 = vmul.f32 1.442695, %v273_v42  ;;  %v358_v26 = vadd.s32 24, %v814_v31  ;;  %v295_v51 = vmul.f32 1.442695, %v831_v44 }
 0x11e   :  { %575 = vpow2.f32 %v287_v47  ;;  %v360_v32 = vadd.s32 40, %v814_v31  ;;  %vm378_vm6 = vcmp.eq.s32.totalorder %v357_v22, %v866_v48  ;;  %v392_v55 = vsel %vm376_vm4, %v269_v37, 0.0 }
 0x11f   :  { %577 = vpow2.f32 %v289_v14  ;;  %v297_v56 = vmul.f32 1.442695, %v835_v45  ;;  %v393_v58 = vsel %vm377_vm5, %v270_v38, 0.0  ;;  %vm379_vm7 = vcmp.eq.s32.totalorder %v358_v26, %v866_v48 }
 0x120   :  { %579 = vpow2.f32 %v291_v49  ;;  %v299_v62 = vmul.f32 1.442695, %v839_v12  ;;  %v394_v63 = vsel %vm378_vm6, %v271_v40, 0.0  ;;  %v408_v0 = vsel %vm231_vm2, %v392_v55, 0.0 }
 0x121   :  { %581 = vpow2.f32 %v293_v50  ;;  %vm381_vm9 = vcmp.eq.s32.totalorder %v360_v32, %v866_v48  ;;  %v409_v2 = vsel %vm231_vm2, %v393_v58, 0.0  ;;  %v301_v3 = vmul.f32 1.442695, %v842_v15 }
 0x122   :  { %583 = vpow2.f32 %v295_v51  ;;  %v395_v4 = vsel %vm379_vm7, %v272_v41, 0.0  ;;  %v410_v5 = vadd.f32 %v409_v2, %v408_v0  ;;  %v303_v7 = vmul.f32 1.442695, %v845_v20 }
 0x123   :  { %585 = vpow2.f32 %v297_v56  ;;  %v411_v8 = vsel %vm231_vm2, %v394_v63, 0.0  ;;  %v396_v11 = vsel %vm380_vm8, %v273_v42, 0.0  ;;  %v305_v17 = vmul.f32 1.442695, %v849_v23 }
 0x124   :  { %587 = vpow2.f32 %v299_v62  ;;  %v412_v13 = vadd.f32 %v411_v8, %v410_v5  ;;  %v413_v21 = vsel %vm231_vm2, %v395_v4, 0.0  ;;  %v397_v27 = vsel %vm381_vm9, %v831_v44, 0.0 }
 0x125   :  { %589 = vpow2.f32 %v301_v3  ;;  %v307_v30 = vmul.f32 1.442695, %v853_v28  ;;  %v415_v36 = vsel %vm231_vm2, %v396_v11, 0.0  ;;  %v924_v37 = vsub.f32 %v770_v39, %v816_v35 }
 0x126   :  { %v414_v29 = vadd.f32 %v413_v21, %v412_v13  ;;  %591 = vpow2.f32 %v303_v7  ;;  %v398_v41 = vsel %vm382_vm10, %v835_v45, 0.0  ;;  %v309_v44 = vmul.f32 1.442695, %v857_v34 }
 0x127   :  { %v574_v6 = vpop.eup %573  ;;  %v417_v47 = vsel %vm231_vm2, %v397_v27, 0.0  ;;  %593 = vpow2.f32 %v305_v17  ;;  %v399_v35 = vsel %vm383_vm11, %v839_v12, 0.0  ;;  %v311_v45 = vmul.f32 1.442695, %v861_v43 }
 0x128   :  { %v576_v9 = vpop.eup %575  ;;  %v317_v10 = vsel %vm231_vm2, %v574_v6, 0.0  ;;  %v416_v42 = vadd.f32 %v415_v36, %v414_v29  ;;  %v419_v50 = vsel %vm231_vm2, %v398_v41, 0.0  ;;  %595 = vpow2.f32 %v307_v30 }
 0x129   :  { %v578_v16 = vpop.eup %577  ;;  %v318_v19 = vsel %vm231_vm2, %v576_v9, 0.0  ;;  %v400_v52 = vsel %vm384_vm12, %v842_v15, 0.0  ;;  %v401_v54 = vsel %vm385_vm13, %v845_v20, 0.0  ;;  %v421_v55 = vsel %vm231_vm2, %v399_v35, 0.0 }
 0x12a   :  { %v580_v24 = vpop.eup %579  ;;  %v319_v25 = vadd.f32 %v318_v19, %v317_v10  ;;  %v320_v33 = vsel %vm231_vm2, %v578_v16, 0.0  ;;  %v418_v49 = vadd.f32 %v417_v47, %v416_v42  ;;  %597 = vpow2.f32 %v309_v44 }
 0x12b   :  { %v582_v38 = vpop.eup %581  ;;  %v322_v46 = vsel %vm231_vm2, %v580_v24, 0.0  ;;  %v313_v63 = vmul.f32 1.442695, %v870_v18  ;;  %v402_v57 = vsel %vm386_vm14, %v849_v23, 0.0  ;;  %v423_v20 = vsel %vm231_vm2, %v400_v52, 0.0 }
 0x12c   :  { %v321_v40 = vadd.f32 %v320_v33, %v319_v25  ;;  %v584_v14 = vpop.eup %583  ;;  %v324_v22 = vsel %vm231_vm2, %v582_v38, 0.0  ;;  %v420_v32 = vadd.f32 %v419_v50, %v418_v49  ;;  %599 = vpow2.f32 %v311_v45 }
 0x12d   :  { %v586_v26 = vpop.eup %585  ;;  %v326_v12 = vsel %vm231_vm2, %v584_v14, 0.0  ;;  %v315_v3 = vmul.f32 1.442695, %v924_v37  ;;  %v425_v61 = vsel %vm231_vm2, %v401_v54, 0.0  ;;  %v369_v5 = vadd.s32 112, %v814_v31 }
 0x12e   :  { %v323_v39 = vadd.f32 %v322_v46, %v321_v40  ;;  %v588_v56 = vpop.eup %587  ;;  %v422_v62 = vadd.f32 %v421_v55, %v420_v32  ;;  %v328_v15 = vsel %vm231_vm2, %v586_v26, 0.0  ;;  %v403_v23 = vsel %vm387_vm15, %v853_v28, 0.0 }
 0x12f   :  { %v590_v59 = vpop.eup %589  ;;  %v330_v4 = vsel %vm231_vm2, %v588_v56, 0.0  ;;  %601 = vpow2.f32 %v313_v63  ;;  %v427_v9 = vsel %vm231_vm2, %v402_v57, 0.0  ;;  %v370_v10 = vadd.s32 120, %v814_v31 }
 0x130   :  { %v325_v51 = vadd.f32 %v324_v22, %v323_v39  ;;  %v424_v2 = vadd.f32 %v423_v20, %v422_v62  ;;  %v592_v6 = vpop.eup %591  ;;  %v332_v8 = vsel %vm231_vm2, %v590_v59, 0.0  ;;  %v404_v13 = vsel %vm388_vm0, %v857_v34, 0.0 }
 0x131   :  { %v594_v11 = vpop.eup %593  ;;  %603 = vpow2.f32 %v315_v3  ;;  %v334_v17 = vsel %vm231_vm2, %v592_v6, 0.0  ;;  %v429_v28 = vsel %vm231_vm2, %v403_v23, 0.0  ;;  %vm390_vm4 = vcmp.eq.s32.totalorder %v369_v5, %v866_v48 }
 0x132   :  { %v327_v58 = vadd.f32 %v326_v12, %v325_v51  ;;  %v426_v7 = vadd.f32 %v425_v61, %v424_v2  ;;  %v596_v19 = vpop.eup %595  ;;  %v405_v24 = vsel %vm389_vm1, %v861_v43, 0.0  ;;  %v336_v27 = vsel %vm231_vm2, %v594_v11, 0.0 }
 0x133   :  { %v431_v31 = vsel %vm231_vm2, %v404_v13, 0.0  ;;  %vm391_vm5 = vcmp.eq.s32.totalorder %v370_v10, %v866_v48  ;;  %v406_v33 = vsel %vm390_vm4, %v870_v18, 0.0  ;;  %v338_v36 = vsel %vm231_vm2, %v596_v19, 0.0 }
 0x134   :  { %v329_v0 = vadd.f32 %v328_v15, %v327_v58  ;;  %v428_v16 = vadd.f32 %v427_v9, %v426_v7  ;;  %v598_v34 = vpop.eup %597  ;;  %v433_v38 = vsel %vm231_vm2, %v405_v24, 0.0  ;;  %v407_v43 = vsel %vm391_vm5, %v924_v37, 0.0 }
 0x135   :  { %v340_v44 = vsel %vm231_vm2, %v598_v34, 0.0  ;;  %v435_v46 = vsel %vm231_vm2, %v406_v33, 0.0  ;;  %v437_v18 = vsel %vm231_vm2, %v407_v43, 0.0 }
 0x136   :  { %v331_v60 = vadd.f32 %v330_v4, %v329_v0  ;;  %v430_v25 = vadd.f32 %v429_v28, %v428_v16  ;;  %v600_v40 = vpop.eup %599 }
 0x137   :  { %v342_v39 = vsel %vm231_vm2, %v600_v40, 0.0 }
 0x138   :  { %v333_v1 = vadd.f32 %v332_v8, %v331_v60  ;;  %v432_v30 = vadd.f32 %v431_v31, %v430_v25 }
 0x139   :  { %v602_v47 = vpop.eup %601 }
 0x13a   :  { %v335_v21 = vadd.f32 %v334_v17, %v333_v1  ;;  %v434_v42 = vadd.f32 %v433_v38, %v432_v30  ;;  %v344_v22 = vsel %vm231_vm2, %v602_v47, 0.0 }
 0x13b   :  { %v604_v35 = vpop.eup %603 }
 0x13c   :  { %v337_v29 = vadd.f32 %v336_v27, %v335_v21  ;;  %v436_v14 = vadd.f32 %v435_v46, %v434_v42  ;;  %v346_v26 = vsel %vm231_vm2, %v604_v35, 0.0 }
 0x13e   :  { %v339_v41 = vadd.f32 %v338_v36, %v337_v29  ;;  %v438_v45 = vadd.f32 %v437_v18, %v436_v14 }
 0x140   :  { %v341_v48 = vadd.f32 %v340_v44, %v339_v41  ;;  %v439_v32 = vrot.slane %v438_v45, 4 }
 0x142   :  { %v343_v49 = vadd.f32 %v342_v39, %v341_v48  ;;  %v440_v54 = vadd.f32 %v439_v32, %v438_v45 }
 0x144   :  { %v345_v50 = vadd.f32 %v344_v22, %v343_v49  ;;  %v441_v58 = vrot.slane %v440_v54, 2 }
 0x146   :  { %v347_v37 = vadd.f32 %v346_v26, %v345_v50  ;;  %v442_v62 = vadd.f32 %v441_v58, %v440_v54 }
 0x148   :  { %v348_v51 = vrot.slane %v347_v37, 4  ;;  %v443_v63 = vrot.slane %v442_v62, 1 }
 0x14a   :  { %v349_v52 = vadd.f32 %v348_v51, %v347_v37  ;;  %v444_v57 = vadd.f32 %v443_v63, %v442_v62 }
 0x14c   :  { %v350_v12 = vrot.slane %v349_v52, 2 }
 0x14e   :  { %v351_v53 = vadd.f32 %v350_v12, %v349_v52 }
 0x150   :  { %v352_v55 = vrot.slane %v351_v53, 1 }
 0x152   :  { %v353_v56 = vadd.f32 %v352_v55, %v351_v53 }
 0x154   :  { %605 = vlog2.f32 %v353_v56 }
 0x15e   :  { %v606_v15 = vpop.eup %605 }
 0x15f   :  { %v446_v20 = vmul.f32 0.6931472, %v606_v15 }
 0x161   :  { %v447_v59 = vsub.f32 %v444_v57, %v446_v20 }
 0x163   :  { %449 = vst.msk [vmem:[#allocation3] sm:$0x1] %vm448_vm3, %v447_v59 }
 0x164   :  { %640 = shalt.err (!%p637_p12)
}
 0x165   :  { %s641_s7 = scalar_lea.hbm %s1008_s4, 16 }
 0x166   :  { %p642_p13 = scmp.ne.s32.totalorder %s1008_s4, %s641_s7  ;;  %p645_p0 = scmp.lt.u32.totalorder %s641_s7, %s1008_s4 }
 0x168   :  { %p647_p1 = pnand %p645_p0, %p642_p13 }
 0x16a   :  { %650 = shalt.err (!%p647_p1)
}
 0x16b   :  { %463 = dma.vmem_to_hbm [thread:$0]  %s461_s27, 16, %s1008_s4, [#allocation4]  }
 0x16c   :  { %651 = dma.done.wait [#allocation4], 16  }
 0x16d   :  { %652 = vsyncadd [#allocation4], 4294967280 }
 0x16e   :  { %653 = dma.done.wait [#allocation6], 16  }
 0x16f   :  { %654 = vsyncadd [#allocation6], 4294967280 }
 0x170   :  { %480 = vsyncpa [#allocation4], 1 }
 0x171   :  { %481 = vsyncpa [#allocation6], 1 }

</bundles_post_ra>
